<compile_context>
chip_gen: v7x
topology: tpu7x:2x2x1
jax: 0.10.0
libtpu: 0.0.40
codegen_flags: <defaults>
</compile_context>

<pallas_src>
import functools

import jax
import jax.numpy as jnp
from jax import lax
from jax.experimental import pallas as pl
from jax.experimental.pallas import tpu as pltpu


def _round_up(x, m):
    return (x + m - 1) // m * m


def init_embedding_params(embedding_weight):
    """One-time (init-time) prep: pad d_model up to a lane-dense multiple of 128.

    Hoisted out of the per-call wrapper: padding the table per call is a full
    V x Dp HBM read+write that can cost more than the gather itself.
    """
    _, d = embedding_weight.shape
    dp = max(128, _round_up(d, 128))
    if dp != d:
        embedding_weight = jnp.pad(embedding_weight, ((0, 0), (0, dp - d)))
    return embedding_weight


def _pick_tok_block(n_tokens, target):
    # Prefer the largest block <= target that divides the token count exactly
    # (no token padding -> epilogue is a pure view when Dp == d_model).
    for cand in (target, 1024, 512, 256, 128, 64, 32, 16, 8):
        if cand <= target and cand <= n_tokens and cand % 8 == 0 and n_tokens % cand == 0:
            return cand
    # No nice divisor: fall back to a 128-token block and pad the token axis.
    return min(target, 128)


# --------------------------- gather path (HBM table) ------------------------

def _gather_kernel(ids_ref, emb_hbm, o_ref, sems, *, scale, tok):
    # ids_ref : (n_blocks, tok) int32 in SMEM (scalar prefetch)
    # emb_hbm : (V, Dp) table ref left in HBM (pl.ANY), never copied wholesale
    # o_ref   : (tok, Dp) output tile in VMEM
    # sems    : (1,) DMA semaphores -> single shared byte-counting semaphore
    blk = pl.program_id(0)
    sem = sems.at[0]

    def issue(t, carry):
        row = ids_ref[blk, t]
        # One row DMA per token: HBM table row -> row t of the output tile.
        pltpu.make_async_copy(emb_hbm.at[row], o_ref.at[t], sem).start()
        return carry

    # Unrolled issue loop: id load / descriptor build / start co-issue, which
    # is what matters once the gather is descriptor-issue bound (v7x).
    lax.fori_loop(0, tok, issue, 0, unroll=8)

    # Single aggregate wait: the DMA semaphore counts bytes, so one wait sized
    # for the full (tok, Dp) tile covers all `tok` row copies at once
    # (src ref is only used for sizing).
    pltpu.make_async_copy(o_ref, o_ref, sem).wait()

    # Apply sqrt(d_model) in place; full lane-dense store also orders the
    # pipelined output writeback after the manual row DMAs.
    o_ref[...] = o_ref[...] * scale


# ------------------ small-table fast path (VMEM-resident) -------------------

def _small_table_kernel(ids_ref, emb_ref, o_ref, *, scale, vocab):
    # ids_ref : (tok, 1) int32 in VMEM; emb_ref : (V, Dp) resident in VMEM
    tok = o_ref.shape[0]
    onehot = (ids_ref[...] == lax.broadcasted_iota(jnp.int32, (tok, vocab), 1)
              ).astype(emb_ref.dtype)
    o_ref[...] = (jnp.dot(onehot, emb_ref[...],
                          preferred_element_type=jnp.float32) * scale
                  ).astype(o_ref.dtype)


# --------------------------------- wrapper ----------------------------------

def input_embedder(x_ids, emb_padded, d_model, *, tok_target=256,
                   small_table_bytes=4 * 1024 * 1024):
    """x_ids: (B, S) int token ids; emb_padded: (V, Dp) table with Dp % 128 == 0
    (pad once with init_embedding_params). Returns (B, S, d_model) float
    = table[x_ids] * sqrt(d_model)."""
    B, S = x_ids.shape
    V, Dp = emb_padded.shape
    D = int(d_model)
    assert Dp % 128 == 0 and D <= Dp
    scale = float(D) ** 0.5
    itemsize = emb_padded.dtype.itemsize

    N = B * S
    tok = _pick_tok_block(N, tok_target)
    n_blocks = pl.cdiv(N, tok)
    N_pad = n_blocks * tok

    ids = x_ids.reshape(-1).astype(jnp.int32)
    # TODO(synk): nn.Embedding raises on out-of-range ids; we clamp instead so
    # a bad id can never trigger an out-of-bounds HBM DMA.
    ids = jnp.clip(ids, 0, V - 1)
    if N_pad != N:
        ids = jnp.pad(ids, (0, N_pad - N))  # padded tokens gather row 0, sliced below

    out_tile_bytes = tok * Dp * itemsize
    table_bytes = V * Dp * itemsize

    if table_bytes <= small_table_bytes:
        # Small-table fast path: table resident in VMEM, in-core one-hot @ table.
        vmem_limit = int(min(64 << 20,
                             max(32 << 20, 2 * table_bytes + 2 * out_tile_bytes + (2 << 20))))
        out = pl.pallas_call(
            functools.partial(_small_table_kernel, scale=scale, vocab=V),
            out_shape=jax.ShapeDtypeStruct((N_pad, Dp), emb_padded.dtype),
            grid_spec=pl.GridSpec(
                grid=(n_blocks,),
                in_specs=[
                    pl.BlockSpec((tok, 1), lambda i: (i, 0)),    # ids (VMEM)
                    pl.BlockSpec((V, Dp), lambda i: (0, 0)),     # table, resident
                ],
                out_specs=pl.BlockSpec((tok, Dp), lambda i: (i, 0)),
            ),
            compiler_params=pltpu.CompilerParams(
                dimension_semantics=("parallel",),
                vmem_limit_bytes=vmem_limit),
        )(ids.reshape(N_pad, 1), emb_padded)
    else:
        # Gather path: table stays in HBM, per-row DMA gather into output tile.
        vmem_limit = int(min(64 << 20,
                             max(32 << 20, 2 * out_tile_bytes + (2 << 20))))
        out = pl.pallas_call(
            functools.partial(_gather_kernel, scale=scale, tok=tok),
            out_shape=jax.ShapeDtypeStruct((N_pad, Dp), emb_padded.dtype),
            grid_spec=pltpu.PrefetchScalarGridSpec(
                num_scalar_prefetch=1,                      # ids -> SMEM (2-D)
                grid=(n_blocks,),
                in_specs=[
                    pl.BlockSpec(memory_space=pl.ANY),      # table stays in HBM
                ],
                out_specs=pl.BlockSpec((tok, Dp), lambda i, ids: (i, 0)),
                scratch_shapes=[pltpu.SemaphoreType.DMA((1,))],  # ONE shared sem
            ),
            compiler_params=pltpu.CompilerParams(
                dimension_semantics=("parallel",),          # megacore-shardable
                vmem_limit_bytes=vmem_limit),
        )(ids.reshape(n_blocks, tok), emb_padded)

    # When tok divides B*S and Dp == d_model this is a pure view + reshape.
    if N_pad != N or Dp != D:
        out = out[:N, :D]
    return out.reshape(B, S, D)


if __name__ == "__main__":
    d_model = 32
    vocab_size = 64
    B, S = 2, 8

    key = jax.random.PRNGKey(0)
    k_emb, k_ids, k_ids2 = jax.random.split(key, 3)

    # nn.Embedding default init: N(0, 1)
    emb_table = jax.random.normal(k_emb, (vocab_size, d_model), dtype=jnp.float32)
    x_ids = jax.random.randint(k_ids, (B, S), 0, vocab_size, dtype=jnp.int32)

    # One-time init-time padding of d_model to a multiple of 128 (hoisted out
    # of the per-call wrapper per perf feedback).
    emb_padded = init_embedding_params(emb_table)
    scale = d_model ** 0.5

    # 1) Small-table fast path (the module's test shapes).
    out = jax.block_until_ready(input_embedder(x_ids, emb_padded, d_model=d_model))
    ref = jnp.take(emb_table, x_ids, axis=0) * scale
    assert out.shape == (B, S, d_model)
    assert out.dtype == jnp.float32
    assert jnp.allclose(out, ref, atol=1e-5, rtol=1e-5)

    # 2) HBM-gather path (forced), multiple grid blocks to exercise the single
    #    shared DMA semaphore / aggregate wait and the unrolled issue loop.
    B2, S2 = 2, 256
    x_ids2 = jax.random.randint(k_ids2, (B2, S2), 0, vocab_size, dtype=jnp.int32)
    out2 = jax.block_until_ready(
        input_embedder(x_ids2, emb_padded, d_model=d_model, small_table_bytes=0))
    ref2 = jnp.take(emb_table, x_ids2, axis=0) * scale
    assert out2.shape == (B2, S2, d_model)
    assert out2.dtype == jnp.float32
    assert jnp.allclose(out2, ref2, atol=1e-5, rtol=1e-5)

    print("KERNEL_OK")
</pallas_src>

<mosaic_0001>
module attributes {stable_mosaic.version = 11 : i64} {
  func.func @_small_table_kernel(%arg0: i32, %arg1: memref<16x1xi32, #tpu.memory_space<vmem>>, %arg2: memref<64x128xf32, #tpu.memory_space<vmem>>, %arg3: memref<16x128xf32, #tpu.memory_space<vmem>>) attributes {dimension_semantics = [#tpu.dimension_semantics<parallel>], iteration_bounds = array<i64: 1>, scalar_prefetch = 0 : i64, scratch_operands = 0 : i64, tpu.core_type = #tpu.core_type<tc>, window_params = [{transform_indices = @transform_0, window_bounds = array<i64: 16, 1>}, {pipeline_mode = #tpu.pipeline_mode<synchronous>, transform_indices = @transform_1, window_bounds = array<i64: 64, 128>}, {transform_indices = @transform_2, window_bounds = array<i64: 16, 128>}]} {
    %c0 = arith.constant 0 : index
    %c0_0 = arith.constant 0 : index
    %0 = vector.load %arg1[%c0, %c0_0] : memref<16x1xi32, #tpu.memory_space<vmem>>, vector<16x1xi32>
    %1 = tpu.iota {dimensions = array<i32: 1>} : vector<16x64xi32>
    %2 = vector.broadcast %0 : vector<16x1xi32> to vector<16x64xi32>
    %3 = arith.cmpi eq, %2, %1 : vector<16x64xi32>
    %4 = arith.extui %3 : vector<16x64xi1> to vector<16x64xi32>
    %5 = arith.sitofp %4 : vector<16x64xi32> to vector<16x64xf32>
    %c0_1 = arith.constant 0 : index
    %c0_2 = arith.constant 0 : index
    %6 = vector.load %arg2[%c0_1, %c0_2] : memref<64x128xf32, #tpu.memory_space<vmem>>, vector<64x128xf32>
    %cst = arith.constant dense<0.000000e+00> : vector<16x128xf32>
    %7 = tpu.matmul %5, %6, %cst {dimension_numbers = #tpu.dot_dimension_numbers<[1], [0], [0], [1], [0, 0, 1, 1], [], []>} : vector<16x64xf32>, vector<64x128xf32>, vector<16x128xf32> -> vector<16x128xf32>
    %cst_3 = arith.constant 5.65685415 : f32
    %8 = vector.broadcast %cst_3 : f32 to vector<16x128xf32>
    %9 = arith.mulf %7, %8 : vector<16x128xf32>
    %c0_4 = arith.constant 0 : index
    %c0_5 = arith.constant 0 : index
    %10 = vector.load %arg3[%c0_4, %c0_5] : memref<16x128xf32, #tpu.memory_space<vmem>>, vector<16x128xf32>
    tpu.vector_store %arg3[%c0_4, %c0_5], %9 {strides = array<i32>} : memref<16x128xf32, #tpu.memory_space<vmem>>, vector<16x128xf32>,
    return
  }
  func.func @transform_0(%arg0: i32) -> (i32, i32) {
    %c0_i32 = arith.constant 0 : i32
    %c0_i32_0 = arith.constant 0 : i32
    return %arg0, %c0_i32 : i32, i32
  }
  func.func @transform_1(%arg0: i32) -> (i32, i32) {
    %c0_i32 = arith.constant 0 : i32
    %c0_i32_0 = arith.constant 0 : i32
    %c0_i32_1 = arith.constant 0 : i32
    return %c0_i32, %c0_i32_0 : i32, i32
  }
  func.func @transform_2(%arg0: i32) -> (i32, i32) {
    %c0_i32 = arith.constant 0 : i32
    %c0_i32_0 = arith.constant 0 : i32
    return %arg0, %c0_i32 : i32, i32
  }
}

</mosaic_0001>

<bundles_post_ra>
// kernel: tpu_custom_call.1
= control target key start
LH: loop header
LB: loop body
LE: loop exit
PB: predicated region body
PF: predicated region fallthrough
CT: control target
= control target key end

     0   :  { %7 = vsyncpa [#allocation3], 0  ;;  %s314_s0 = inlined_call_operand.vmem [shape: s32[16,1], index: 0, kind: input, shape index: {}]   ;;  %s315_s1 = inlined_call_operand.hbm [shape: f32[64,128], index: 1, kind: input, shape index: {}]   ;;  %s316_s2 = inlined_call_operand.hbm [shape: f32[16,128], index: 2, kind: output, shape index: {}]  }
   0x1   :  { %8 = vsyncpa [#allocation4], 0  ;;  %s257_s9 = smov [#allocation2]   ;;  %s209_s13 = scalar_lea.hbm %s315_s1, 1024 }
   0x2   :  { %s16_s10 = sshll.u32 %s257_s9, 4  ;;  %p210_p0 = scmp.ne.s32.totalorder %s315_s1, %s209_s13  ;;  %s17_s10 = int_to_ptr.vmem [resolvable:$true] %s16_s10 }
   0x3   :  { %p213_p1 = scmp.lt.u32.totalorder %s209_s13, %s315_s1 }
   0x5   :  { %p215_p2 = pnand %p213_p1, %p210_p0 }
   0x7   :  { %218 = shalt.err (!%p215_p2)
}
   0x8   :  { %s219_s18 = scalar_lea.vmem %s17_s10, 1024  ;;  %p224_p4 = scmp.lt.s32.totalorder %s17_s10, %s17_s10 }
   0x9   :  { %p220_p3 = scmp.ne.s32.totalorder %s17_s10, %s219_s18  ;;  %p225_p5 = scmp.lt.s32.totalorder %s219_s18, %s219_s18 }
   0xb   :  { %p226_p6 = por %p225_p5, %p224_p4 }
   0xd   :  { %p227_p7 = pnand %p226_p6, %p220_p3 }
   0xf   :  { %230 = shalt.err (!%p227_p7)
}
  0x10   :  { %s258_s19 = smov 128   ;;  %s259_s20 = smov 8  }
  0x11   :  { %22 = dma.hbm_to_vmem [thread:$0]  %s315_s1, 1024, %s17_s10, [#allocation3], %s258_s19, %s258_s19, %s259_s20  }
  0x12   :  { %253 = dma.done.wait [#allocation3], 1024  }
  0x13   :  { %254 = vsyncadd [#allocation3], 4294966272  ;;  %v260_v0 = vmov 0   ;;  %v26_v1 = vld [vmem:[%s314_s0] sm:$0xff]  ;;  %v43_v3 = vld [vmem:[#allocation2 + $0x8] sm:$0xff]  ;;  %v28_v15 = vlaneseq  ;;  %vm50_vm0 = vcmask 523264  }
  0x14   :  { %208 = vset.pattern.permute.xlu0 %v260_v0  ;;  %v42_v2 = vld [vmem:[#allocation2] sm:$0xff]  ;;  %v44_v4 = vld [vmem:[#allocation2 + $0x10] sm:$0xff]  ;;  %v45_v5 = vld [vmem:[#allocation2 + $0x18] sm:$0xff]  ;;  %v261_v18 = vmov 0.0  }
  0x15   :  { %31 = vperm.xlu0 %208, %v26_v1   ;;  %v27_v6 = vld [vmem:[%s314_s0 + $0x8] sm:$0xff]  ;;  %v186_v7 = vpack.c.bf16 %v43_v3, %v42_v2  ;;  %v190_v8 = vpack.c.bf16 %v45_v5, %v44_v4  ;;  %v46_v9 = vld [vmem:[#allocation2 + $0x20] sm:$0xff]  ;;  %v48_v12 = vld [vmem:[#allocation2 + $0x30] sm:$0xff]  ;;  %v29_v16 = vand.u32 127, %v28_v15  ;;  %s262_s0 = smov [#allocation5]  }
  0x16   :  { %v47_v10 = vld [vmem:[#allocation2 + $0x28] sm:$0xff]  ;;  %v49_v13 = vld [vmem:[#allocation2 + $0x38] sm:$0xff]  ;;  %s141_s1 = sshll.u32 %s262_s0, 4  ;;  %s142_s1 = int_to_ptr.vmem [resolvable:$true] %s141_s1 }
  0x17   :  { %187 = vmatprep.subr.bf16.mxu0 %v186_v7  ;;  %v194_v11 = vpack.c.bf16 %v47_v10, %v46_v9  ;;  %v198_v14 = vpack.c.bf16 %v49_v13, %v48_v12  ;;  %s231_s27 = scalar_lea.vmem %s142_s1, 256  ;;  %p236_p9 = scmp.lt.s32.totalorder %s142_s1, %s142_s1 }
  0x18   :  { %189 = vmatpush3.bf16.msra.mxu0 %v186_v7  ;;  %p232_p8 = scmp.ne.s32.totalorder %s142_s1, %s231_s27  ;;  %p237_p10 = scmp.lt.s32.totalorder %s231_s27, %s231_s27 }
  0x19   :  { %34 = vperm.xlu0 %208, %v27_v6   ;;  %191 = vmatprep.subr.bf16.mxu0 %v190_v8 }
  0x1a   :  { %p238_p11 = por %p237_p10, %p236_p9 }
  0x1c   :  { %193 = vmatpush3.bf16.msra.mxu0 %v190_v8  ;;  %p239_p12 = pnand %p238_p11, %p232_p8 }
  0x1d   :  { %195 = vmatprep.subr.bf16.mxu0 %v194_v11 }
  0x20   :  { %197 = vmatpush3.bf16.msra.mxu0 %v194_v11 }
  0x21   :  { %199 = vmatprep.subr.bf16.mxu0 %v198_v14 }
  0x24   :  { %201 = vmatpush3.bf16.msra.mxu0 %v198_v14 }
  0x94   :  { %v32_v17 = vpop.permute.xlu0 %31 }
  0x95   :  { %vm36_vm1 = vcmp.eq.s32.totalorder %v32_v17, %v29_v16 }
  0x96   :  { %v153_v19 = vsel %vm36_vm1, 1.0, %v261_v18 }
  0x97   :  { %183 = vmatprep.mubr.msk.f32.mxu0 %vm50_vm0, %v153_v19 }
  0x98   :  { %v35_v20 = vpop.permute.xlu0 %34 }
  0x99   :  { %vm37_vm2 = vcmp.eq.s32.totalorder %v35_v20, %v29_v16 }
  0x9a   :  { %v154_v21 = vsel %vm37_vm2, 1.0, %v261_v18 }
  0x9b   :  { %184 = vmatmul.mubr.msk.f32.vlgmr.msra.gmra.mrb[0].mxu0 %vm50_vm0, %v154_v21 }
 0x16e   :  { %v185_v22 = vpop.f32.mrb[0].mxu0 }
 0x16f   :  { %v133_v23 = vmul.f32 5.656854, %v185_v22  ;;  %v123_v24 = vpop.f32.mrb[1].mxu0 }
 0x170   :  { %v132_v25 = vmul.f32 5.656854, %v123_v24 }
 0x171   :  { %135 = vst [vmem:[#allocation5 + $0x8] sm:$0xff] %v133_v23 }
 0x172   :  { %134 = vst [vmem:[#allocation5] sm:$0xff] %v132_v25 }
 0x173   :  { %242 = shalt.err (!%p239_p12)
}
 0x174   :  { %s243_s30 = scalar_lea.hbm %s316_s2, 256 }
 0x175   :  { %p244_p13 = scmp.ne.s32.totalorder %s316_s2, %s243_s30  ;;  %p247_p0 = scmp.lt.u32.totalorder %s243_s30, %s316_s2 }
 0x177   :  { %p249_p1 = pnand %p247_p0, %p244_p13 }
 0x179   :  { %252 = shalt.err (!%p249_p1)
}
 0x17a   :  { %147 = dma.vmem_to_hbm [thread:$0]  %s142_s1, 256, %s316_s2, [#allocation4], %s258_s19, %s258_s19, %s259_s20  }
 0x17b   :  { %255 = dma.done.wait [#allocation4], 256  }
 0x17c   :  { %256 = vsyncadd [#allocation4], 4294967040 }
 0x17d   :  { %151 = vsyncpa [#allocation3], 1 }
 0x17e   :  { %152 = vsyncpa [#allocation4], 1 }

</bundles_post_ra>
